<compile_context>
chip_gen: v6e
topology: v6e:2x2x1
jax: 0.10.0
libtpu: 0.0.40
codegen_flags: <defaults>
</compile_context>

<pallas_src>
import functools

import jax
import jax.numpy as jnp
from jax.experimental import pallas as pl
from jax.experimental.pallas import tpu as pltpu


def _res_classifier_kernel(x_ref, w_ref, b_ref, o_ref):
    # x_ref : (TN, C*HW)   f32   -- batch tile of the flattened feature map
    # w_ref : (C*HW, K_PAD) bf16 -- expanded Linear weight, pre-scaled by 1/(H*W)
    # b_ref : (1, K_PAD)   f32   -- bias; padded class lanes carry -1e30
    # o_ref : (TN, K_PAD)  f32   -- softmax probabilities (pad lanes -> 0)
    x = x_ref[...].astype(jnp.bfloat16)           # cast in vregs, never in HBM
    # Fused global-average-pool + Linear: one MXU contraction over C*HW.
    logits = jnp.dot(x, w_ref[...], preferred_element_type=jnp.float32)
    logits = logits + b_ref[...]                  # pad lanes -> -1e30 -> exp == 0

    # Numerically stable softmax over the class (lane) axis.
    m = jnp.max(logits, axis=-1, keepdims=True)
    e = jnp.exp(logits - m)
    denom = jnp.sum(e, axis=-1, keepdims=True)
    o_ref[...] = (e * pl.reciprocal(denom, approx=True)).astype(o_ref.dtype)


@functools.partial(jax.jit, static_argnames=("block_bytes",))
def res_classifier_forward(x_nchw, weight, bias, *, block_bytes=8 * 1024 * 1024):
    """
    x_nchw : (N, C, H, W) float32
    weight : (n_classes, C) float32  (PyTorch nn.Linear layout)
    bias   : (n_classes,)   float32
    returns: (N, n_classes) float32 softmax probabilities
    """
    N, C, H, W = x_nchw.shape
    n_classes = weight.shape[0]
    HW = H * W
    CHW = C * HW
    K_PAD = max(128, ((n_classes + 127) // 128) * 128)   # lane-dense class dim

    # 2-D lane-dense view of x; contiguous reshape, no copy, no dtype change.
    x2 = x_nchw.reshape(N, CHW)

    # Expanded weight: W_big[c*HW + hw, k] = weight[k, c] / HW, padded to K_PAD,
    # held in bf16 so the fused pool+linear runs as a single bf16 MXU dot.
    wt = jnp.transpose(weight).astype(jnp.float32) * (1.0 / float(HW))   # (C, K)
    wt = jnp.pad(wt, ((0, 0), (0, K_PAD - n_classes)))                   # (C, K_PAD)
    w_big = jnp.broadcast_to(wt[:, None, :], (C, HW, K_PAD))
    w_big = w_big.reshape(CHW, K_PAD).astype(jnp.bfloat16)               # (CHW, K_PAD)

    b2 = jnp.pad(bias.astype(jnp.float32), (0, K_PAD - n_classes),
                 constant_values=-1e30).reshape(1, K_PAD)

    # Batch tile: cap the (dense, f32) input block at ~block_bytes; keep the
    # sublane dim a multiple of 8 when possible.
    per_row_bytes = CHW * 4
    tn = max(1, min(N, block_bytes // per_row_bytes))
    if tn >= 8:
        tn = (tn // 8) * 8
    # v7x megacore: if everything fits in one block but the batch is sizable,
    # split into >= 2 parallel grid steps so both TensorCores get work.
    if tn >= N and N >= 16:
        tn = ((pl.cdiv(N, 2) + 7) // 8) * 8
    grid = (pl.cdiv(N, tn),)

    out = pl.pallas_call(
        _res_classifier_kernel,
        out_shape=jax.ShapeDtypeStruct((N, K_PAD), jnp.float32),
        grid=grid,
        in_specs=[
            pl.BlockSpec((tn, CHW), lambda i: (i, 0)),      # pipelined batch tiles
            pl.BlockSpec((CHW, K_PAD), lambda i: (0, 0)),   # weight stays resident
            pl.BlockSpec((1, K_PAD), lambda i: (0, 0)),     # bias stays resident
        ],
        out_specs=pl.BlockSpec((tn, K_PAD), lambda i: (i, 0)),
        compiler_params=pltpu.CompilerParams(
            dimension_semantics=("parallel",),              # v7x: 2 TCs on batch axis
            vmem_limit_bytes=48 * 1024 * 1024,              # safe on v7x (64 MiB VMEM)
        ),
    )(x2, w_big, b2)

    return out[:, :n_classes]


if __name__ == "__main__":
    # Small shapes consistent with the module (n_filters = C = 4).
    N, C, H, W = 2, 4, 16, 16
    n_classes = 10

    key = jax.random.PRNGKey(0)
    kx, kw, kb = jax.random.split(key, 3)

    x = jax.random.normal(kx, (N, C, H, W), dtype=jnp.float32)

    # nn.Linear-style init: U(-1/sqrt(fan_in), 1/sqrt(fan_in))
    bound = 1.0 / (C ** 0.5)
    weight = jax.random.uniform(kw, (n_classes, C), jnp.float32, -bound, bound)
    bias = jax.random.uniform(kb, (n_classes,), jnp.float32, -bound, bound)

    out = res_classifier_forward(x, weight, bias)
    out = jax.block_until_ready(out)

    # Reference 1: exact module semantics in f32 (kernel uses bf16 x / weight
    # inside the MXU, so allow a modest tolerance).
    pooled_ref = jnp.mean(x, axis=(2, 3))                       # (N, C)
    logits_ref = pooled_ref @ weight.T + bias                   # (N, n_classes)
    probs_ref = jax.nn.softmax(logits_ref, axis=1)

    # Reference 2: same fused math with bf16-quantized operands (tight check
    # of the kernel's dot/softmax itself).
    HW = H * W
    x_bf = x.reshape(N, C * HW).astype(jnp.bfloat16).astype(jnp.float32)
    w_big_ref = jnp.broadcast_to(
        (weight.T.astype(jnp.float32) / HW)[:, None, :], (C, HW, n_classes)
    ).reshape(C * HW, n_classes).astype(jnp.bfloat16).astype(jnp.float32)
    logits_bf = x_bf @ w_big_ref + bias
    probs_bf = jax.nn.softmax(logits_bf, axis=1)

    assert out.shape == (N, n_classes)
    assert jnp.allclose(out, probs_ref, atol=5e-3), "mismatch vs f32 reference"
    assert jnp.allclose(out, probs_bf, atol=2e-3), "mismatch vs bf16-math reference"
    assert jnp.allclose(jnp.sum(out, axis=1), 1.0, atol=2e-3)

    print("KERNEL_OK")
</pallas_src>

<mosaic_0001>
module attributes {stable_mosaic.version = 11 : i64} {
  func.func @_res_classifier_kernel(%arg0: i32, %arg1: memref<2x1024xf32, #tpu.memory_space<vmem>>, %arg2: memref<1024x128xbf16, #tpu.memory_space<vmem>>, %arg3: memref<1x128xf32, #tpu.memory_space<vmem>>, %arg4: memref<2x128xf32, #tpu.memory_space<vmem>>) attributes {dimension_semantics = [#tpu.dimension_semantics<parallel>], iteration_bounds = array<i64: 1>, scalar_prefetch = 0 : i64, scratch_operands = 0 : i64, tpu.core_type = #tpu.core_type<tc>, window_params = [{transform_indices = @transform_0, window_bounds = array<i64: 2, 1024>}, {pipeline_mode = #tpu.pipeline_mode<synchronous>, transform_indices = @transform_1, window_bounds = array<i64: 1024, 128>}, {pipeline_mode = #tpu.pipeline_mode<synchronous>, transform_indices = @transform_2, window_bounds = array<i64: 1, 128>}, {transform_indices = @transform_3, window_bounds = array<i64: 2, 128>}]} {
    %c0 = arith.constant 0 : index
    %c0_0 = arith.constant 0 : index
    %0 = vector.load %arg1[%c0, %c0_0] : memref<2x1024xf32, #tpu.memory_space<vmem>>, vector<2x1024xf32>
    %1 = arith.truncf %0 : vector<2x1024xf32> to vector<2x1024xbf16>
    %c0_1 = arith.constant 0 : index
    %c0_2 = arith.constant 0 : index
    %2 = vector.load %arg2[%c0_1, %c0_2] : memref<1024x128xbf16, #tpu.memory_space<vmem>>, vector<1024x128xbf16>
    %cst = arith.constant dense<0.000000e+00> : vector<2x128xf32>
    %3 = tpu.matmul %1, %2, %cst {dimension_numbers = #tpu.dot_dimension_numbers<[1], [0], [0], [1], [0, 0, 1, 1], [], []>} : vector<2x1024xbf16>, vector<1024x128xbf16>, vector<2x128xf32> -> vector<2x128xf32>
    %c0_3 = arith.constant 0 : index
    %c0_4 = arith.constant 0 : index
    %4 = vector.load %arg3[%c0_3, %c0_4] : memref<1x128xf32, #tpu.memory_space<vmem>>, vector<1x128xf32>
    %5 = vector.broadcast %4 : vector<1x128xf32> to vector<2x128xf32>
    %6 = arith.addf %3, %5 : vector<2x128xf32>
    %cst_5 = arith.constant dense<0xFF800000> : vector<2xf32>
    %7 = vector.multi_reduction <maximumf>, %6, %cst_5 [1] : vector<2x128xf32> to vector<2xf32>
    %8 = vector.shape_cast %7 : vector<2xf32> to vector<2x1xf32>
    %9 = vector.broadcast %8 : vector<2x1xf32> to vector<2x128xf32>
    %10 = arith.subf %6, %9 : vector<2x128xf32>
    %11 = math.exp %10 : vector<2x128xf32>
    %cst_6 = arith.constant dense<0.000000e+00> : vector<2xf32>
    %12 = vector.multi_reduction <add>, %11, %cst_6 [1] : vector<2x128xf32> to vector<2xf32>
    %13 = vector.shape_cast %12 : vector<2xf32> to vector<2x1xf32>
    %14 = tpu.reciprocal %13 {approx = true} : vector<2x1xf32> -> vector<2x1xf32>
    %15 = vector.broadcast %14 : vector<2x1xf32> to vector<2x128xf32>
    %16 = arith.mulf %11, %15 : vector<2x128xf32>
    %c0_7 = arith.constant 0 : index
    %c0_8 = arith.constant 0 : index
    %17 = vector.load %arg4[%c0_7, %c0_8] : memref<2x128xf32, #tpu.memory_space<vmem>>, vector<2x128xf32>
    tpu.vector_store %arg4[%c0_7, %c0_8], %16 {strides = array<i32>} : memref<2x128xf32, #tpu.memory_space<vmem>>, vector<2x128xf32>,
    return
  }
  func.func @transform_0(%arg0: i32) -> (i32, i32) {
    %c0_i32 = arith.constant 0 : i32
    %c0_i32_0 = arith.constant 0 : i32
    return %arg0, %c0_i32 : i32, i32
  }
  func.func @transform_1(%arg0: i32) -> (i32, i32) {
    %c0_i32 = arith.constant 0 : i32
    %c0_i32_0 = arith.constant 0 : i32
    %c0_i32_1 = arith.constant 0 : i32
    return %c0_i32, %c0_i32_0 : i32, i32
  }
  func.func @transform_2(%arg0: i32) -> (i32, i32) {
    %c0_i32 = arith.constant 0 : i32
    %c0_i32_0 = arith.constant 0 : i32
    %c0_i32_1 = arith.constant 0 : i32
    return %c0_i32, %c0_i32_0 : i32, i32
  }
  func.func @transform_3(%arg0: i32) -> (i32, i32) {
    %c0_i32 = arith.constant 0 : i32
    %c0_i32_0 = arith.constant 0 : i32
    return %arg0, %c0_i32 : i32, i32
  }
}

</mosaic_0001>

<bundles_post_ra>
// kernel: res_classifier_forward.1
= control target key start
LH: loop header
LB: loop body
LE: loop exit
PB: predicated region body
PF: predicated region fallthrough
CT: control target
= control target key end

     0   :  { %v24_v28 = vlaneseq  ;;  %v1023_v36 = vmov 1983009808   ;;  %s1255_s0 = inlined_call_operand.vmem [shape: f32[2,1024], index: 0, kind: input, shape index: {}]   ;;  %s1256_s1 = inlined_call_operand.vmem [shape: bf16[1024,128], index: 1, kind: input, shape index: {}]   ;;  %s1257_s2 = inlined_call_operand.vmem [shape: f32[1,128], index: 2, kind: input, shape index: {}]   ;;  %s1258_s3 = inlined_call_operand.hbm [shape: f32[2,128], index: 3, kind: output, shape index: {}]  }
   0x1   :  { %v931_v0 = vld [vmem:[%s1256_s1 + $0x78] sm:$0xff]   ;;  %v935_v4 = vld [vmem:[%s1256_s1 + $0x70] sm:$0xff]   ;;  %v939_v8 = vld [vmem:[%s1256_s1 + $0x68] sm:$0xff]   ;;  %v22_v37 = vunpack.c.l.s4 %v1023_v36 }
   0x2   :  { %v932_v1 = vld [vmem:[%s1256_s1 + $0xf8] sm:$0xff]   ;;  %841 = vmatprep.subr.bf16.mxu0 %v931_v0  ;;  %v936_v5 = vld [vmem:[%s1256_s1 + $0xf0] sm:$0xff]   ;;  %v940_v9 = vld [vmem:[%s1256_s1 + $0xe8] sm:$0xff]   ;;  %v25_v33 = vshrl.u32 %v24_v28, 7 }
   0x3   :  { %v933_v2 = vld [vmem:[%s1256_s1 + $0x38] sm:$0xff]   ;;  %863 = vmatprep.subr.bf16.mxu1 %v932_v1  ;;  %v937_v6 = vld [vmem:[%s1256_s1 + $0x30] sm:$0xff]   ;;  %v941_v10 = vld [vmem:[%s1256_s1 + $0x28] sm:$0xff]   ;;  %v23_v39 = vunpack.c.0.s8 %v22_v37 }
   0x4   :  { %v934_v3 = vld [vmem:[%s1256_s1 + $0xb8] sm:$0xff]   ;;  %842 = vmatpush3.bf16.msra.mxu0 %v933_v2  ;;  %v938_v7 = vld [vmem:[%s1256_s1 + $0xb0] sm:$0xff]   ;;  %v942_v11 = vld [vmem:[%s1256_s1 + $0xa8] sm:$0xff]  }
   0x5   :  { %864 = vmatpush3.bf16.msra.mxu1 %v934_v3  ;;  %843 = vmatprep.subr.bf16.mxu0 %v935_v4  ;;  %v943_v12 = vld [vmem:[%s1256_s1 + $0x60] sm:$0xff]   ;;  %v947_v16 = vld [vmem:[%s1256_s1 + $0x58] sm:$0xff]   ;;  %v951_v20 = vld [vmem:[%s1256_s1 + $0x50] sm:$0xff]   ;;  %v1150_v41 = vsub.s32 %v23_v39, %v25_v33 }
   0x6   :  { %865 = vmatprep.subr.bf16.mxu1 %v936_v5  ;;  %v944_v13 = vld [vmem:[%s1256_s1 + $0xe0] sm:$0xff]   ;;  %v948_v17 = vld [vmem:[%s1256_s1 + $0xd8] sm:$0xff]   ;;  %v952_v21 = vld [vmem:[%s1256_s1 + $0xd0] sm:$0xff]  }
   0x7   :  { %v945_v14 = vld [vmem:[%s1256_s1 + $0x20] sm:$0xff]   ;;  %v949_v18 = vld [vmem:[%s1256_s1 + $0x18] sm:$0xff]   ;;  %v953_v22 = vld [vmem:[%s1256_s1 + $0x10] sm:$0xff]  }
   0x8   :  { %844 = vmatpush3.bf16.msra.mxu0 %v937_v6  ;;  %v946_v15 = vld [vmem:[%s1256_s1 + $0xa0] sm:$0xff]   ;;  %v950_v19 = vld [vmem:[%s1256_s1 + $0x98] sm:$0xff]   ;;  %v954_v23 = vld [vmem:[%s1256_s1 + $0x90] sm:$0xff]  }
   0x9   :  { %866 = vmatpush3.bf16.msra.mxu1 %v938_v7  ;;  %845 = vmatprep.subr.bf16.mxu0 %v939_v8  ;;  %v955_v24 = vld [vmem:[%s1256_s1 + $0x48] sm:$0xff]   ;;  %v959_v29 = vld [vmem:[%s1256_s1 + $0x40] sm:$0xff]   ;;  %v964_v35 = vld [vmem:[%s1256_s1 + $0x178] sm:$0xff]  }
   0xa   :  { %867 = vmatprep.subr.bf16.mxu1 %v940_v9  ;;  %v956_v25 = vld [vmem:[%s1256_s1 + $0xc8] sm:$0xff]   ;;  %v960_v30 = vld [vmem:[%s1256_s1 + $0xc0] sm:$0xff]   ;;  %v965_v38 = vld [vmem:[%s1256_s1 + $0x1f8] sm:$0xff]  }
   0xb   :  { %v957_v26 = vld [vmem:[%s1256_s1 + $0x8] sm:$0xff]   ;;  %v961_v31 = vld [vmem:[%s1256_s1] sm:$0xff]   ;;  %v966_v46 = vld [vmem:[%s1256_s1 + $0x138] sm:$0xff]  }
   0xc   :  { %846 = vmatpush3.bf16.msra.mxu0 %v941_v10  ;;  %v958_v27 = vld [vmem:[%s1256_s1 + $0x88] sm:$0xff]   ;;  %v962_v32 = vld [vmem:[%s1256_s1 + $0x80] sm:$0xff]   ;;  %v967_v49 = vld [vmem:[%s1256_s1 + $0x1b8] sm:$0xff]  }
   0xd   :  { %868 = vmatpush3.bf16.msra.mxu1 %v942_v11  ;;  %847 = vmatprep.subr.bf16.mxu0 %v943_v12  ;;  %v16_v34 = vld [vmem:[%s1255_s0] sm:$0xff]  ;;  %v968_v52 = vld [vmem:[%s1256_s1 + $0x170] sm:$0xff]   ;;  %v972_v56 = vld [vmem:[%s1256_s1 + $0x168] sm:$0xff]  }
   0xe   :  { %869 = vmatprep.subr.bf16.mxu1 %v944_v13  ;;  %v20_v40 = vcombine.high %v16_v34, %v16_v34  ;;  %v27_v42 = vrot.slane %v16_v34, %v1150_v41  ;;  %v969_v53 = vld [vmem:[%s1256_s1 + $0x1f0] sm:$0xff]   ;;  %v973_v57 = vld [vmem:[%s1256_s1 + $0x1e8] sm:$0xff]   ;;  %v976_v60 = vld [vmem:[%s1256_s1 + $0x160] sm:$0xff]  }
   0xf   :  { %v970_v54 = vld [vmem:[%s1256_s1 + $0x130] sm:$0xff]   ;;  %v974_v58 = vld [vmem:[%s1256_s1 + $0x128] sm:$0xff]   ;;  %v977_v61 = vld [vmem:[%s1256_s1 + $0x1e0] sm:$0xff]  }
  0x10   :  { %848 = vmatpush3.bf16.msra.mxu0 %v945_v14  ;;  %v34_v43 = vrot.slane %v20_v40, %v1150_v41  ;;  %v35_v44 = vcombine.high %v27_v42, %v27_v42  ;;  %v62_v47 = vpack.c.bf16 %v27_v42, %v27_v42  ;;  %v971_v55 = vld [vmem:[%s1256_s1 + $0x1b0] sm:$0xff]   ;;  %v975_v59 = vld [vmem:[%s1256_s1 + $0x1a8] sm:$0xff]   ;;  %v978_v62 = vld [vmem:[%s1256_s1 + $0x120] sm:$0xff]  }
  0x11   :  { %870 = vmatpush3.bf16.msra.mxu1 %v946_v15  ;;  %849 = vmatprep.subr.bf16.mxu0 %v947_v16  ;;  %v979_v63 = vld [vmem:[%s1256_s1 + $0x1a0] sm:$0xff]   ;;  %v980_v0 = vld [vmem:[%s1256_s1 + $0x158] sm:$0xff]   ;;  %v984_v4 = vld [vmem:[%s1256_s1 + $0x150] sm:$0xff]  }
  0x12   :  { %871 = vmatprep.subr.bf16.mxu1 %v948_v17  ;;  %v36_v45 = vcombine.high %v34_v43, %v34_v43  ;;  %v64_v48 = vpack.c.bf16 %v34_v43, %v34_v43  ;;  %v63_v50 = vpack.c.bf16 %v35_v44, %v35_v44  ;;  %v981_v1 = vld [vmem:[%s1256_s1 + $0x1d8] sm:$0xff]   ;;  %v985_v5 = vld [vmem:[%s1256_s1 + $0x1d0] sm:$0xff]   ;;  %v988_v8 = vld [vmem:[%s1256_s1 + $0x148] sm:$0xff]  }
  0x13   :  { %v982_v2 = vld [vmem:[%s1256_s1 + $0x118] sm:$0xff]   ;;  %v986_v6 = vld [vmem:[%s1256_s1 + $0x110] sm:$0xff]   ;;  %v989_v9 = vld [vmem:[%s1256_s1 + $0x1c8] sm:$0xff]  }
  0x14   :  { %850 = vmatpush3.bf16.msra.mxu0 %v949_v18  ;;  %v65_v51 = vpack.c.bf16 %v36_v45, %v36_v45  ;;  %621 = vmatprep.mubr.bf16.mxu0 %v63_v50  ;;  %v983_v3 = vld [vmem:[%s1256_s1 + $0x198] sm:$0xff]   ;;  %v987_v7 = vld [vmem:[%s1256_s1 + $0x190] sm:$0xff]   ;;  %v17_v10 = vld [vmem:[%s1255_s0 + $0x8] sm:$0xff] }
  0x15   :  { %872 = vmatpush3.bf16.msra.mxu1 %v950_v19  ;;  %851 = vmatprep.subr.bf16.mxu0 %v951_v20 }
  0x16   :  { %873 = vmatprep.subr.bf16.mxu1 %v952_v21  ;;  %661 = vmatprep.mubr.bf16.mxu1 %v65_v51 }
  0x18   :  { %852 = vmatpush3.bf16.msra.mxu0 %v953_v22 }
  0x19   :  { %874 = vmatpush3.bf16.msra.mxu1 %v954_v23  ;;  %853 = vmatprep.subr.bf16.mxu0 %v955_v24 }
  0x1a   :  { %875 = vmatprep.subr.bf16.mxu1 %v956_v25 }
  0x1c   :  { %854 = vmatpush3.bf16.msra.mxu0 %v957_v26 }
  0x1d   :  { %876 = vmatpush3.bf16.msra.mxu1 %v958_v27  ;;  %855 = vmatprep.subr.bf16.mxu0 %v959_v29 }
  0x1e   :  { %877 = vmatprep.subr.bf16.mxu1 %v960_v30 }
  0x20   :  { %856 = vmatpush3.bf16.msra.mxu0 %v961_v31 }
  0x21   :  { %878 = vmatpush3.bf16.msra.mxu1 %v962_v32  ;;  %885 = vmatprep.subr.bf16.mxu0 %v964_v35 }
  0x22   :  { %907 = vmatprep.subr.bf16.mxu1 %v965_v38 }
  0x23   :  { %622 = vmatmul.mubr.bf16.vlgmr.msra.gmra.mxu0 %v62_v47 }
  0x24   :  { %662 = vmatmul.mubr.bf16.vlgmr.msra.gmra.mxu1 %v64_v48  ;;  %886 = vmatpush3.bf16.msra.mxu0 %v966_v46 }
  0x25   :  { %908 = vmatpush3.bf16.msra.mxu1 %v967_v49  ;;  %887 = vmatprep.subr.bf16.mxu0 %v968_v52 }
  0x26   :  { %909 = vmatprep.subr.bf16.mxu1 %v969_v53 }
  0x28   :  { %888 = vmatpush3.bf16.msra.mxu0 %v970_v54 }
  0x29   :  { %910 = vmatpush3.bf16.msra.mxu1 %v971_v55  ;;  %889 = vmatprep.subr.bf16.mxu0 %v972_v56 }
  0x2a   :  { %911 = vmatprep.subr.bf16.mxu1 %v973_v57 }
  0x2c   :  { %890 = vmatpush3.bf16.msra.mxu0 %v974_v58 }
  0x2d   :  { %912 = vmatpush3.bf16.msra.mxu1 %v975_v59  ;;  %891 = vmatprep.subr.bf16.mxu0 %v976_v60 }
  0x2e   :  { %913 = vmatprep.subr.bf16.mxu1 %v977_v61 }
  0x30   :  { %892 = vmatpush3.bf16.msra.mxu0 %v978_v62 }
  0x31   :  { %914 = vmatpush3.bf16.msra.mxu1 %v979_v63  ;;  %893 = vmatprep.subr.bf16.mxu0 %v980_v0 }
  0x32   :  { %915 = vmatprep.subr.bf16.mxu1 %v981_v1 }
  0x34   :  { %894 = vmatpush3.bf16.msra.mxu0 %v982_v2 }
  0x35   :  { %916 = vmatpush3.bf16.msra.mxu1 %v983_v3  ;;  %895 = vmatprep.subr.bf16.mxu0 %v984_v4 }
  0x36   :  { %917 = vmatprep.subr.bf16.mxu1 %v985_v5 }
  0x37   :  { %8 = vsyncpa [#allocation3], 0  ;;  %v44_v11 = vrot.slane %v17_v10, %v1150_v41  ;;  %v37_v12 = vcombine.high %v17_v10, %v17_v10  ;;  %v990_v13 = vld [vmem:[%s1256_s1 + $0x108] sm:$0xff]   ;;  %v992_v17 = vld [vmem:[%s1256_s1 + $0x140] sm:$0xff]   ;;  %vm749_vm0 = vcmask 1041408  }
  0x38   :  { %896 = vmatpush3.bf16.msra.mxu0 %v986_v6  ;;  %v991_v14 = vld [vmem:[%s1256_s1 + $0x188] sm:$0xff]   ;;  %v993_v18 = vld [vmem:[%s1256_s1 + $0x1c0] sm:$0xff]  }
  0x39   :  { %918 = vmatpush3.bf16.msra.mxu1 %v987_v7  ;;  %v52_v15 = vcombine.high %v44_v11, %v44_v11  ;;  %v51_v16 = vrot.slane %v37_v12, %v1150_v41  ;;  %897 = vmatprep.subr.bf16.mxu0 %v988_v8  ;;  %v994_v21 = vld [vmem:[%s1256_s1 + $0x100] sm:$0xff]   ;;  %v66_v24 = vpack.c.bf16 %v44_v11, %v44_v11 }
  0x3a   :  { %919 = vmatprep.subr.bf16.mxu1 %v989_v9  ;;  %v995_v22 = vld [vmem:[%s1256_s1 + $0x180] sm:$0xff]  }
  0x3b   :  { %v67_v19 = vpack.c.bf16 %v52_v15, %v52_v15  ;;  %v53_v20 = vcombine.high %v51_v16, %v51_v16  ;;  %v68_v25 = vpack.c.bf16 %v51_v16, %v51_v16  ;;  %v776_v35 = vld [vmem:[%s1257_s2] ss:$0 sm:$0xff]  ;;  %s1024_s2 = smov [#allocation2]  }
  0x3c   :  { %898 = vmatpush3.bf16.msra.mxu0 %v990_v13  ;;  %s768_s9 = sshll.u32 %s1024_s2, 4  ;;  %s769_s9 = int_to_ptr.vmem [resolvable:$true] %s768_s9 }
  0x3d   :  { %920 = vmatpush3.bf16.msra.mxu1 %v991_v14  ;;  %v69_v23 = vpack.c.bf16 %v53_v20, %v53_v20  ;;  %899 = vmatprep.subr.bf16.mxu0 %v992_v17  ;;  %s1001_s10 = scalar_lea.vmem %s769_s9, 32  ;;  %p1006_p1 = scmp.lt.s32.totalorder %s769_s9, %s769_s9 }
  0x3e   :  { %921 = vmatprep.subr.bf16.mxu1 %v993_v18  ;;  %701 = vmatprep.mubr.bf16.mxu0 %v67_v19  ;;  %p1002_p0 = scmp.ne.s32.totalorder %s769_s9, %s1001_s10  ;;  %p1007_p2 = scmp.lt.s32.totalorder %s1001_s10, %s1001_s10 }
  0x3f   :  { %741 = vmatprep.mubr.bf16.mxu1 %v69_v23 }
  0x40   :  { %900 = vmatpush3.bf16.msra.mxu0 %v994_v21  ;;  %p1008_p3 = por %p1007_p2, %p1006_p1 }
  0x41   :  { %922 = vmatpush3.bf16.msra.mxu1 %v995_v22 }
  0x42   :  { %p1009_p4 = pnand %p1008_p3, %p1002_p0 }
  0x43   :  { %702 = vmatmul.mubr.bf16.vlgmr.msra.gmra.mxu0 %v66_v24 }
  0x44   :  { %742 = vmatmul.mubr.bf16.vlgmr.msra.gmra.mxu1 %v68_v25 }
  0xe3   :  { %v857_v26 = vpop.f32.mrf.mxu0 }
  0xe4   :  { %v879_v27 = vpop.f32.mrf.mxu1 }
  0xe5   :  { %v858_v28 = vpop.f32.mrf.mxu0 }
  0xe6   :  { %v880_v29 = vpop.f32.mrf.mxu1  ;;  %v859_v34 = vadd.f32 %v858_v28, %v857_v26 }
  0xe7   :  { %v860_v30 = vpop.f32.mrf.mxu0  ;;  %v881_v37 = vadd.f32 %v880_v29, %v879_v27 }
  0xe8   :  { %v882_v31 = vpop.f32.mrf.mxu1  ;;  %v624_v36 = vadd.f32 %v859_v34, %v776_v35 }
  0xe9   :  { %v861_v32 = vpop.f32.mrf.mxu0 }
  0xea   :  { %v883_v33 = vpop.f32.mrf.mxu1  ;;  %v664_v42 = vadd.f32 %v881_v37, %v624_v36 }
 0x103   :  { %v901_v38 = vpop.f32.mrf.mxu0 }
 0x104   :  { %v923_v39 = vpop.f32.mrf.mxu1 }
 0x105   :  { %v902_v40 = vpop.f32.mrf.mxu0 }
 0x106   :  { %v924_v41 = vpop.f32.mrf.mxu1  ;;  %v903_v43 = vadd.f32 %v902_v40, %v901_v38 }
 0x107   :  { %v904_v44 = vpop.f32.mrf.mxu0  ;;  %v925_v47 = vadd.f32 %v924_v41, %v923_v39 }
 0x108   :  { %v926_v45 = vpop.f32.mrf.mxu1  ;;  %v704_v46 = vadd.f32 %v903_v43, %v664_v42 }
 0x109   :  { %v905_v48 = vpop.f32.mrf.mxu0 }
 0x10a   :  { %v927_v49 = vpop.f32.mrf.mxu1  ;;  %v744_v50 = vadd.f32 %v925_v47, %v704_v46 }
 0x10c   :  { %v750_v51 = vsel %vm749_vm0, %v744_v50, -inf }
 0x10d   :  { %751 = vmax.xlane.f32.xlu0 %v750_v51 }
 0x196   :  { %v752_v52 = vpop.xlane.xlu0 %751 }
 0x197   :  { %v753_v53 = vsub.f32 %v744_v50, %v752_v52 }
 0x199   :  { %v754_v54 = vmul.f32 1.442695, %v753_v53 }
 0x19b   :  { %997 = vpow2.f32 %v754_v54 }
 0x1a8   :  { %v998_v55 = vpop.eup %997 }
 0x1a9   :  { %v756_v56 = vsel %vm749_vm0, %v998_v55, 0.0 }
 0x1aa   :  { %757 = vadd.xlane.f32.xlu0 %v756_v56 }
 0x233   :  { %v758_v57 = vpop.xlane.xlu0 %757 }
 0x234   :  { %999 = vrcp.f32 %v758_v57 }
 0x241   :  { %v1000_v58 = vpop.eup %999 }
 0x242   :  { %v760_v59 = vmul.f32 %v1000_v58, %v998_v55 }
 0x244   :  { %761 = vst [vmem:[#allocation2] sm:$0x3] %v760_v59 }
 0x245   :  { %1012 = shalt.err (!%p1009_p4)
}
 0x246   :  { %771 = dma.vmem_to_hbm [thread:$0]  %s769_s9, 32, %s1258_s3, [#allocation3]  }
 0x247   :  { %1021 = dma.done.wait [#allocation3], 32  }
 0x248   :  { %1022 = vsyncadd [#allocation3], 4294967264 }
 0x249   :  { %775 = vsyncpa [#allocation3], 1 }

</bundles_post_ra>
